<compile_context>
chip_gen: v5e
topology: v5e:2x2
jax: 0.10.0
libtpu: 0.0.40
codegen_flags: <defaults>
</compile_context>

<pallas_src>
import functools

import jax
import jax.numpy as jnp
from jax.experimental import pallas as pl
from jax.experimental.pallas import tpu as pltpu


def _focal_loss_kernel(logits_ref, target_ref, out_ref, *,
                       gamma, n_total, block_rows, steps_per_core, needs_mask):
    core = pl.program_id(0)   # TensorCore split ("parallel")
    i = pl.program_id(1)      # row-block sweep  ("arbitrary")

    @pl.when(i == 0)
    def _():
        out_ref[...] = jnp.zeros_like(out_ref)

    # TODO(synk): when logits arrive as bf16 on v6e/v7x, keep the (TN, C) passes
    # in bf16 and only accumulate sumexp/picked in f32 (v5e has no bf16 VPU/EUP).
    logits = logits_ref[...].astype(jnp.float32)            # (TN, C)
    tgt = target_ref[...]                                    # (TN, 1) int32
    tn, c = logits.shape

    # numerically-stable log-sum-exp (matches torch log_softmax behaviour);
    # `shifted` is reused below so the raw logits block is traversed only once.
    m = jnp.max(logits, axis=-1, keepdims=True)              # (TN, 1)
    shifted = logits - m                                      # (TN, C)
    sumexp = jnp.sum(jnp.exp(shifted), axis=-1, keepdims=True)

    # gather shifted[i, target[i]] via masked select (no dynamic gather on vregs)
    col = jax.lax.broadcasted_iota(jnp.int32, (tn, c), 1)
    picked = jnp.sum(jnp.where(col == tgt, shifted, 0.0), axis=-1, keepdims=True)

    ce = jnp.log(sumexp) - picked                             # per-sample CE
    p = jnp.exp(-ce)
    one_minus_p = jnp.maximum(1.0 - p, 0.0)                   # clamp: ce can be ~-eps

    # (1 - p) ** gamma, specialized on the static Python gamma
    if gamma == 0.0:
        focal = ce
    elif float(gamma).is_integer() and 0.0 < gamma <= 4.0:
        w = one_minus_p
        for _ in range(int(gamma) - 1):
            w = w * one_minus_p
        focal = w * ce
    else:
        focal = jnp.exp(jnp.float32(gamma)
                        * jnp.log(jnp.maximum(one_minus_p, jnp.float32(1e-30)))) * ce

    if needs_mask:
        # Rows of the ragged last block / clamped duplicate blocks (>= N) must
        # contribute zero.  NOTE: this where() must stay *before* the reduction
        # -- select does not propagate NaN/garbage from the padding rows.
        g = core * steps_per_core + i                         # logical block id
        row = g * block_rows + jax.lax.broadcasted_iota(jnp.int32, (tn, 1), 0)
        focal = jnp.where(row < n_total, focal, 0.0)

    # Accumulate into the core-resident output block (one vreg, broadcast add);
    # collapsed to a true scalar and divided by N in the wrapper.
    out_ref[...] += jnp.sum(focal)


def _vmem_capacity_bytes():
    try:
        cap = getattr(pltpu.get_tpu_info(), "vmem_capacity_bytes", None)
        if cap:
            return int(cap)
    except Exception:
        pass
    return 64 * 1024 * 1024          # conservative default = v7x per-TC VMEM


def _default_num_cores():
    # TODO(synk): query TensorCores-per-chip from the runtime once exposed.
    try:
        if "v7" in jax.devices()[0].device_kind.lower():
            return 2
    except Exception:
        pass
    return 1


def _pick_block_rows(n, c, itemsize, vmem_limit, max_rows=32768):
    """Largest multiple-of-8 row tile sized by the lane-padded VMEM footprint."""
    if n <= 8:
        return n
    c_pad = pl.cdiv(c, 128) * 128                      # logits lane padding
    # logits block + (TN,1) int32 target block (lane-padded to 128), both
    # double-buffered by the pipeline -> per-block budget ~ 1/4 of the limit.
    bytes_per_row = c_pad * itemsize + 128 * 4
    block_budget = max(1, vmem_limit // 4)
    rows_fit = max(8, (block_budget // bytes_per_row) // 8 * 8)
    tn = min(max_rows, rows_fit, n)
    return max(8, (tn // 8) * 8)


def focal_loss_pallas(logits, target, gamma=0.0, weight=None,
                      num_cores=None, block_rows=None):
    """FocalLoss.forward equivalent.  weight unsupported (module default None)."""
    assert weight is None  # TODO(synk): per-class weight support (module default is None)
    assert gamma >= 0
    n, c = logits.shape
    assert n >= 1
    target2d = target.astype(jnp.int32).reshape(n, 1)

    vmem_cap = _vmem_capacity_bytes()
    # 48 MiB on v7x (64 MiB physical), 96 MiB on v5e/v6e (128 MiB physical).
    vmem_limit = min(vmem_cap * 3 // 4, 96 * 1024 * 1024)

    if block_rows is None:
        tn = _pick_block_rows(n, c, jnp.dtype(logits.dtype).itemsize, vmem_limit)
    else:
        tn = min(int(block_rows), n)
        tn = n if n <= 8 else max(8, (tn // 8) * 8)

    if num_cores is None:
        num_cores = _default_num_cores()
    num_cores = max(1, int(num_cores))

    nblocks = pl.cdiv(n, tn)
    spc = pl.cdiv(nblocks, num_cores)                  # inner steps per core
    needs_mask = (n % tn != 0) or (nblocks % num_cores != 0)

    def in_index(core, i):
        g = core * spc + i
        return (jnp.minimum(g, nblocks - 1), 0)        # clamp fully-padded blocks

    kernel = functools.partial(
        _focal_loss_kernel, gamma=float(gamma), n_total=n, block_rows=tn,
        steps_per_core=spc, needs_mask=needs_mask)

    # TODO(synk): for very large C add a third (innermost, "arbitrary") grid
    # axis over class tiles with an online LSE carry.
    out = pl.pallas_call(
        kernel,
        out_shape=jax.ShapeDtypeStruct((num_cores * 8, 128), jnp.float32),
        grid_spec=pltpu.PrefetchScalarGridSpec(
            num_scalar_prefetch=0,
            grid=(num_cores, spc),
            in_specs=[
                pl.BlockSpec((tn, c), in_index),
                pl.BlockSpec((tn, 1), in_index),
            ],
            out_specs=pl.BlockSpec((8, 128), lambda core, i: (core, 0)),
        ),
        compiler_params=pltpu.CompilerParams(
            dimension_semantics=("parallel", "arbitrary"),
            vmem_limit_bytes=vmem_limit,
        ),
    )(logits, target2d)

    partial_sums = out[0::8, 0]                        # one partial sum per core
    return jnp.sum(partial_sums) / jnp.float32(n)


def _focal_loss_ref(logits, target, gamma):
    logp = jax.nn.log_softmax(logits.astype(jnp.float32), axis=-1)
    ce = -jnp.take_along_axis(logp, target[:, None].astype(jnp.int32), axis=-1)[:, 0]
    p = jnp.exp(-ce)
    return jnp.mean((1.0 - p) ** gamma * ce)


if __name__ == "__main__":
    key = jax.random.PRNGKey(0)
    num_classes = 32

    configs = [
        # (batch, num_cores override, block_rows override)
        (8,   None, None),   # single tile, auto core count
        (20,  None, None),   # ragged last tile + masking
        (8,   2,    None),   # forced 2-core split: clamped duplicate block path
        (20,  2,    None),   # forced 2-core split: one block per core + ragged
        (300, 2,    64),     # multi-step inner loop per core + ragged + clamp
        (300, 1,    64),     # multi-step single-core accumulation
    ]

    for batch, ncores, brows in configs:
        k1, k2 = jax.random.split(jax.random.fold_in(key, batch))
        logits = jax.random.normal(k1, (batch, num_classes), dtype=jnp.float32)
        target = jax.random.randint(k2, (batch,), 0, num_classes, dtype=jnp.int32)

        for gamma in (0.0, 2.0, 1.5):
            out = focal_loss_pallas(logits, target, gamma=gamma,
                                    num_cores=ncores, block_rows=brows)
            out = jax.block_until_ready(out)
            ref = _focal_loss_ref(logits, target, gamma)
            assert jnp.allclose(out, ref, rtol=1e-5, atol=1e-5), (
                batch, ncores, brows, gamma, out, ref)

    print("KERNEL_OK")
</pallas_src>

<mosaic_0001>
module attributes {stable_mosaic.version = 11 : i64} {
  func.func @_focal_loss_kernel(%arg0: i32, %arg1: i32, %arg2: memref<8x32xf32, #tpu.memory_space<vmem>>, %arg3: memref<8x1xi32, #tpu.memory_space<vmem>>, %arg4: memref<8x128xf32, #tpu.memory_space<vmem>>) attributes {dimension_semantics = [#tpu.dimension_semantics<parallel>, #tpu.dimension_semantics<arbitrary>], iteration_bounds = array<i64: 1, 1>, scalar_prefetch = 0 : i64, scratch_operands = 0 : i64, tpu.core_type = #tpu.core_type<tc>, window_params = [{transform_indices = @transform_0, window_bounds = array<i64: 8, 32>}, {transform_indices = @transform_1, window_bounds = array<i64: 8, 1>}, {transform_indices = @transform_2, window_bounds = array<i64: 8, 128>}]} {
    %c0_i32 = arith.constant 0 : i32
    %0 = arith.cmpi eq, %arg1, %c0_i32 : i32
    %1 = arith.extui %0 : i1 to i32
    %c0_i32_0 = arith.constant 0 : i32
    %2 = arith.cmpi ne, %1, %c0_i32_0 : i32
    scf.if %2 {
      %cst_12 = arith.constant 0.000000e+00 : f32
      %29 = vector.broadcast %cst_12 : f32 to vector<8x128xf32>
      %c0_13 = arith.constant 0 : index
      %c0_14 = arith.constant 0 : index
      %30 = vector.load %arg4[%c0_13, %c0_14] : memref<8x128xf32, #tpu.memory_space<vmem>>, vector<8x128xf32>
      tpu.vector_store %arg4[%c0_13, %c0_14], %29 {strides = array<i32>} : memref<8x128xf32, #tpu.memory_space<vmem>>, vector<8x128xf32>,
    } else {
    }
    %c0 = arith.constant 0 : index
    %c0_1 = arith.constant 0 : index
    %3 = vector.load %arg2[%c0, %c0_1] : memref<8x32xf32, #tpu.memory_space<vmem>>, vector<8x32xf32>
    %c0_2 = arith.constant 0 : index
    %c0_3 = arith.constant 0 : index
    %4 = vector.load %arg3[%c0_2, %c0_3] : memref<8x1xi32, #tpu.memory_space<vmem>>, vector<8x1xi32>
    %cst = arith.constant dense<0xFF800000> : vector<8xf32>
    %5 = vector.multi_reduction <maximumf>, %3, %cst [1] : vector<8x32xf32> to vector<8xf32>
    %6 = vector.shape_cast %5 : vector<8xf32> to vector<8x1xf32>
    %7 = vector.broadcast %6 : vector<8x1xf32> to vector<8x32xf32>
    %8 = arith.subf %3, %7 : vector<8x32xf32>
    %9 = math.exp %8 : vector<8x32xf32>
    %cst_4 = arith.constant dense<0.000000e+00> : vector<8xf32>
    %10 = vector.multi_reduction <add>, %9, %cst_4 [1] : vector<8x32xf32> to vector<8xf32>
    %11 = vector.shape_cast %10 : vector<8xf32> to vector<8x1xf32>
    %12 = tpu.iota {dimensions = array<i32: 1>} : vector<8x32xi32>
    %13 = vector.broadcast %4 : vector<8x1xi32> to vector<8x32xi32>
    %14 = arith.cmpi eq, %12, %13 : vector<8x32xi32>
    %cst_5 = arith.constant 0.000000e+00 : f32
    %15 = vector.broadcast %cst_5 : f32 to vector<8x32xf32>
    %16 = arith.select %14, %8, %15 : vector<8x32xi1>, vector<8x32xf32>
    %cst_6 = arith.constant dense<0.000000e+00> : vector<8xf32>
    %17 = vector.multi_reduction <add>, %16, %cst_6 [1] : vector<8x32xf32> to vector<8xf32>
    %18 = vector.shape_cast %17 : vector<8xf32> to vector<8x1xf32>
    %19 = math.log %11 : vector<8x1xf32>
    %20 = arith.subf %19, %18 : vector<8x1xf32>
    %c0_7 = arith.constant 0 : index
    %c0_8 = arith.constant 0 : index
    %21 = vector.load %arg4[%c0_7, %c0_8] : memref<8x128xf32, #tpu.memory_space<vmem>>, vector<8x128xf32>
    %22 = vector.shape_cast %20 : vector<8x1xf32> to vector<1x8x1xf32>
    %cst_9 = arith.constant dense<0.000000e+00> : vector<1xf32>
    %23 = vector.multi_reduction <add>, %22, %cst_9 [1, 2] : vector<1x8x1xf32> to vector<1xf32>
    %24 = vector.shape_cast %23 : vector<1xf32> to vector<1x1x1xf32>
    %25 = vector.extract %24[0, 0, 0] : f32 from vector<1x1x1xf32>
    %26 = vector.broadcast %25 : f32 to vector<8x128xf32>
    %27 = arith.addf %21, %26 : vector<8x128xf32>
    %c0_10 = arith.constant 0 : index
    %c0_11 = arith.constant 0 : index
    %28 = vector.load %arg4[%c0_10, %c0_11] : memref<8x128xf32, #tpu.memory_space<vmem>>, vector<8x128xf32>
    tpu.vector_store %arg4[%c0_10, %c0_11], %27 {strides = array<i32>} : memref<8x128xf32, #tpu.memory_space<vmem>>, vector<8x128xf32>,
    return
  }
  func.func @transform_0(%arg0: i32, %arg1: i32) -> (i32, i32) {
    %c1_i32 = arith.constant 1 : i32
    %0 = arith.muli %arg0, %c1_i32 : i32
    %1 = arith.addi %0, %arg1 : i32
    %c0_i32 = arith.constant 0 : i32
    %2 = arith.minsi %1, %c0_i32 : i32
    %c0_i32_0 = arith.constant 0 : i32
    %c0_i32_1 = arith.constant 0 : i32
    return %2, %c0_i32_0 : i32, i32
  }
  func.func @transform_1(%arg0: i32, %arg1: i32) -> (i32, i32) {
    %c1_i32 = arith.constant 1 : i32
    %0 = arith.muli %arg0, %c1_i32 : i32
    %1 = arith.addi %0, %arg1 : i32
    %c0_i32 = arith.constant 0 : i32
    %2 = arith.minsi %1, %c0_i32 : i32
    %c0_i32_0 = arith.constant 0 : i32
    %c0_i32_1 = arith.constant 0 : i32
    return %2, %c0_i32_0 : i32, i32
  }
  func.func @transform_2(%arg0: i32, %arg1: i32) -> (i32, i32) {
    %c0_i32 = arith.constant 0 : i32
    %c0_i32_0 = arith.constant 0 : i32
    return %arg0, %c0_i32 : i32, i32
  }
}

</mosaic_0001>

<bundles_post_ra>
// kernel: tpu_custom_call.1
= control target key start
LH: loop header
LB: loop body
LE: loop exit
PB: predicated region body
PF: predicated region fallthrough
CT: control target
= control target key end

     0   :  { %vm73_vm0 = vcmask 261120   ;;  %s204_s0 = inlined_call_operand.vmem [shape: f32[8,32], index: 0, kind: input, shape index: {}]   ;;  %s205_s1 = inlined_call_operand.vmem [shape: s32[8,1], index: 1, kind: input, shape index: {}]   ;;  %s206_s2 = inlined_call_operand.hbm [shape: f32[8,128], index: 2, kind: output, shape index: {}]  }
   0x1   :  { %v71_v0 = vld [vmem:[%s204_s0] sm:$0xff] }
   0x2   :  { %7 = vsyncpa [#allocation3], 0  ;;  %v74_v1 = vsel %vm73_vm0, %v71_v0, -inf  ;;  %v175_v2 = vmov 0   ;;  %v72_v3 = vld [vmem:[%s205_s1] sm:$0xff]  ;;  %v83_v9 = vlaneseq  ;;  %vm97_vm2 = vcmask 7168  }
   0x3   :  { %144 = vset.pattern.permute.xlu0 %v175_v2  ;;  %s176_s0 = smov [#allocation2]   ;;  %s118_s15 = sshll.u32 %s206_s2, 4  ;;  %s119_s15 = int_to_ptr.hbm [resolvable:$true] %s118_s15 }
   0x4   :  { %75 = vmax.xlane.f32.xlu0 %v74_v1  ;;  %v84_v10 = vand.u32 127, %v83_v9  ;;  %s116_s1 = sshll.u32 %s176_s0, 4  ;;  %s117_s1 = int_to_ptr.vmem [resolvable:$true] %s116_s1 }
  0x18   :  { %86 = vperm.xlu0 %144, %v72_v3  }
  0x77   :  { %v76_v4 = vpop.xlane.xlu0 %75 }
  0x78   :  { %v77_v5 = vsub.f32 %v71_v0, %v76_v4 }
  0x7a   :  { %v78_v6 = vmul.f32 1.442695, %v77_v5 }
  0x7c   :  { %145 = vpow2.f32 %v78_v6 }
  0x82   :  { %v146_v7 = vpop.eup %145 }
  0x83   :  { %v80_v8 = vsel %vm73_vm0, %v146_v7, 0.0 }
  0x84   :  { %81 = vadd.xlane.f32.xlu1 %v80_v8 }
  0x8a   :  { %v87_v11 = vpop.permute.xlu0 %86 }
  0x8b   :  { %vm88_vm1 = vcmp.eq.s32.totalorder %v84_v10, %v87_v11 }
  0x8c   :  { %v89_v12 = vsel %vm88_vm1, %v77_v5, 0.0 }
  0x8d   :  { %v90_v13 = vsel %vm73_vm0, %v89_v12, 0.0 }
  0x8e   :  { %91 = vadd.xlane.f32.xlu1 %v90_v13 }
  0xf7   :  { %v82_v14 = vpop.xlane.xlu1 %81 }
  0xf8   :  { %147 = vlog2.f32 %v82_v14 }
  0xfe   :  { %v148_v15 = vpop.eup %147 }
  0xff   :  { %v94_v16 = vmul.f32 0.6931472, %v148_v15 }
 0x101   :  { %v92_v17 = vpop.xlane.xlu1 %91 }
 0x102   :  { %v95_v18 = vsub.f32 %v94_v16, %v92_v17 }
 0x104   :  { %v98_v19 = vsel %vm97_vm2, %v95_v18, 0.0 }
 0x105   :  { %99 = vadd.xlane.f32.xlu2 %v98_v19 }
 0x178   :  { %v100_v20 = vpop.xlane.xlu2 %99 }
 0x179   :  { %v101_v21 = vrot.slane %v100_v20, 4 }
 0x17b   :  { %v102_v22 = vadd.f32 %v101_v21, %v100_v20 }
 0x17d   :  { %v103_v23 = vrot.slane %v102_v22, 2 }
 0x17f   :  { %v104_v24 = vadd.f32 %v103_v23, %v102_v22 }
 0x181   :  { %v105_v25 = vrot.slane %v104_v24, 1 }
 0x183   :  { %v106_v26 = vadd.f32 %v105_v25, %v104_v24 }
 0x185   :  { %139 = vpush %v106_v26 }
 0x1b6   :  { %s140_s16 = spop %139 }
 0x1b7   :  { %v108_v27 = vstv %s140_s16 }
 0x1b8   :  { %110 = vst [vmem:[#allocation2] sm:$0xff] %v108_v27 }
 0x1b9   :  { %121 = dma.vmem_to_hbm [thread:$0]  %s117_s1, 128, %s119_s15, [#allocation3]  }
 0x1ba   :  { %173 = dma.done.wait [#allocation3], 128  }
 0x1bb   :  { %174 = vsyncadd [#allocation3], 4294967168 }
 0x1bc   :  { %126 = vsyncpa [#allocation3], 1 }

</bundles_post_ra>
